<compile_context>
chip_gen: v7x
topology: tpu7x:2x2x1
jax: 0.10.0
libtpu: 0.0.40
codegen_flags: <defaults>
</compile_context>

<pallas_src>
import functools

import jax
import jax.numpy as jnp
from jax.experimental import pallas as pl
from jax.experimental.pallas import tpu as pltpu

_LANES = 128
_SUBLANES = 8


def _round_up(x, n):
    return pl.cdiv(x, n) * n


def _head_kernel(x_ref, w_ref, b_ref, o_ref):
    # x_ref: (TM, H)  w_ref: (H, Lp)  b_ref: (1, Lp) f32  o_ref: (TM, Lp)
    acc = jnp.dot(x_ref[...], w_ref[...], preferred_element_type=jnp.float32)
    o_ref[...] = (acc + b_ref[...]).astype(o_ref.dtype)


def fold_head_params(w_dense, b_dense, w_out, b_out, *, compute_dtype=None):
    """Fold dense + out_proj into a single affine map. Run ONCE at model load.

    Weights are (in_features, out_features) (torch weight.T). Fold is done in
    f32 for accuracy, then W is cast to `compute_dtype` so the kernel dot runs
    on the MXU's native path when features are bf16. The output columns are
    zero-padded to a full 128-lane tile (unmasked stores in the kernel).
    """
    hidden = w_dense.shape[0]
    num_labels = w_out.shape[-1]
    if compute_dtype is None:
        compute_dtype = w_dense.dtype

    w1 = w_dense.astype(jnp.float32)
    w2 = w_out.astype(jnp.float32)
    b1 = b_dense.reshape(1, hidden).astype(jnp.float32)
    b2 = b_out.reshape(1, num_labels).astype(jnp.float32)

    w_fold = jnp.dot(w1, w2, preferred_element_type=jnp.float32)
    b_fold = jnp.dot(b1, w2, preferred_element_type=jnp.float32) + b2

    l_pad = _round_up(num_labels, _LANES)
    if l_pad != num_labels:
        w_fold = jnp.pad(w_fold, ((0, 0), (0, l_pad - num_labels)))
        b_fold = jnp.pad(b_fold, ((0, 0), (0, l_pad - num_labels)))

    return w_fold.astype(compute_dtype), b_fold, num_labels


@functools.partial(jax.jit, static_argnames=("num_labels", "block_rows"))
def wav2vec2_regression_head(features, w_fold, b_fold, *, num_labels,
                             block_rows=1024):
    """features: [..., H]; w_fold: (H, Lp) compute dtype; b_fold: (1, Lp) f32."""
    orig_shape = features.shape
    hidden = orig_shape[-1]
    l_pad = w_fold.shape[-1]

    x2d = features.reshape(-1, hidden)
    m = x2d.shape[0]

    # Row tile: multiple of 8 sublanes, capped at block_rows.  No pad of x --
    # grid = cdiv(m, tm); Pallas masks the final partial tile's stores and any
    # garbage rows it reads only feed output rows that are never written back.
    tm = min(block_rows, _round_up(m, _SUBLANES))
    n_steps = pl.cdiv(m, tm)
    if n_steps < 2 and m > _SUBLANES:
        # Guarantee >=2 grid steps so both v7x TensorCores get work.
        tm = _round_up(pl.cdiv(m, 2), _SUBLANES)
        n_steps = pl.cdiv(m, tm)

    out = pl.pallas_call(
        _head_kernel,
        out_shape=jax.ShapeDtypeStruct((m, l_pad), features.dtype),
        grid=(n_steps,),
        in_specs=[
            pl.BlockSpec((tm, hidden), lambda i: (i, 0)),      # x streams
            pl.BlockSpec((hidden, l_pad), lambda i: (0, 0)),   # W resident
            pl.BlockSpec((1, l_pad), lambda i: (0, 0)),        # b resident
        ],
        out_specs=pl.BlockSpec((tm, l_pad), lambda i: (i, 0)),
        compiler_params=pltpu.CompilerParams(
            dimension_semantics=("parallel",),
            vmem_limit_bytes=40 * 1024 * 1024,
        ),
    )(x2d, w_fold, b_fold)

    # Under jit this slice fuses into the consumer instead of a second pass.
    out = out[:, :num_labels]
    return out.reshape(*orig_shape[:-1], num_labels)


if __name__ == "__main__":
    # config: hidden_size=32, num_labels=4, final_dropout=0.1 (eval -> identity)
    B, S, H, L = 2, 8, 32, 4

    key = jax.random.PRNGKey(0)
    k_x, k_w1, k_b1, k_w2, k_b2 = jax.random.split(key, 5)

    features = jax.random.normal(k_x, (B, S, H), dtype=jnp.float32)

    # Parameters (nn.Linear(H, H) / nn.Linear(H, L)), stored transposed:
    # (in_features, out_features).
    w_dense = jax.random.normal(k_w1, (H, H), dtype=jnp.float32) * 0.02
    b_dense = jax.random.normal(k_b1, (H,), dtype=jnp.float32) * 0.02
    w_out = jax.random.normal(k_w2, (H, L), dtype=jnp.float32) * 0.02
    b_out = jax.random.normal(k_b2, (L,), dtype=jnp.float32) * 0.02

    # One-time parameter fold (off the per-call hot path).
    w_fold, b_fold, num_labels = fold_head_params(
        w_dense, b_dense, w_out, b_out, compute_dtype=features.dtype)
    w_fold, b_fold = jax.block_until_ready((w_fold, b_fold))

    out = wav2vec2_regression_head(features, w_fold, b_fold,
                                   num_labels=num_labels)
    out = jax.block_until_ready(out)

    # Reference in plain JAX (unfused two-step, as PyTorch computes it).
    ref = features.reshape(-1, H) @ w_dense + b_dense
    ref = (ref @ w_out + b_out).reshape(B, S, L)
    assert out.shape == (B, S, L), out.shape
    assert jnp.allclose(out, ref, atol=1e-5, rtol=1e-5), float(
        jnp.max(jnp.abs(out - ref)))

    print("KERNEL_OK")
</pallas_src>

<mosaic_0001>
module attributes {stable_mosaic.version = 11 : i64} {
  func.func @_head_kernel(%arg0: i32, %arg1: memref<8x32xf32, #tpu.memory_space<vmem>>, %arg2: memref<32x128xf32, #tpu.memory_space<vmem>>, %arg3: memref<1x128xf32, #tpu.memory_space<vmem>>, %arg4: memref<8x128xf32, #tpu.memory_space<vmem>>) attributes {dimension_semantics = [#tpu.dimension_semantics<parallel>], iteration_bounds = array<i64: 2>, scalar_prefetch = 0 : i64, scratch_operands = 0 : i64, tpu.core_type = #tpu.core_type<tc>, window_params = [{transform_indices = @transform_0, window_bounds = array<i64: 8, 32>}, {pipeline_mode = #tpu.pipeline_mode<synchronous>, transform_indices = @transform_1, window_bounds = array<i64: 32, 128>}, {pipeline_mode = #tpu.pipeline_mode<synchronous>, transform_indices = @transform_2, window_bounds = array<i64: 1, 128>}, {transform_indices = @transform_3, window_bounds = array<i64: 8, 128>}]} {
    %c0 = arith.constant 0 : index
    %c0_0 = arith.constant 0 : index
    %0 = vector.load %arg1[%c0, %c0_0] : memref<8x32xf32, #tpu.memory_space<vmem>>, vector<8x32xf32>
    %c0_1 = arith.constant 0 : index
    %c0_2 = arith.constant 0 : index
    %1 = vector.load %arg2[%c0_1, %c0_2] : memref<32x128xf32, #tpu.memory_space<vmem>>, vector<32x128xf32>
    %cst = arith.constant dense<0.000000e+00> : vector<8x128xf32>
    %2 = tpu.matmul %0, %1, %cst {dimension_numbers = #tpu.dot_dimension_numbers<[1], [0], [0], [1], [0, 0, 1, 1], [], []>} : vector<8x32xf32>, vector<32x128xf32>, vector<8x128xf32> -> vector<8x128xf32>
    %c0_3 = arith.constant 0 : index
    %c0_4 = arith.constant 0 : index
    %3 = vector.load %arg3[%c0_3, %c0_4] : memref<1x128xf32, #tpu.memory_space<vmem>>, vector<1x128xf32>
    %4 = vector.broadcast %3 : vector<1x128xf32> to vector<8x128xf32>
    %5 = arith.addf %2, %4 : vector<8x128xf32>
    %c0_5 = arith.constant 0 : index
    %c0_6 = arith.constant 0 : index
    %6 = vector.load %arg4[%c0_5, %c0_6] : memref<8x128xf32, #tpu.memory_space<vmem>>, vector<8x128xf32>
    tpu.vector_store %arg4[%c0_5, %c0_6], %5 {strides = array<i32>} : memref<8x128xf32, #tpu.memory_space<vmem>>, vector<8x128xf32>,
    return
  }
  func.func @transform_0(%arg0: i32) -> (i32, i32) {
    %c0_i32 = arith.constant 0 : i32
    %c0_i32_0 = arith.constant 0 : i32
    return %arg0, %c0_i32 : i32, i32
  }
  func.func @transform_1(%arg0: i32) -> (i32, i32) {
    %c0_i32 = arith.constant 0 : i32
    %c0_i32_0 = arith.constant 0 : i32
    %c0_i32_1 = arith.constant 0 : i32
    return %c0_i32, %c0_i32_0 : i32, i32
  }
  func.func @transform_2(%arg0: i32) -> (i32, i32) {
    %c0_i32 = arith.constant 0 : i32
    %c0_i32_0 = arith.constant 0 : i32
    %c0_i32_1 = arith.constant 0 : i32
    return %c0_i32, %c0_i32_0 : i32, i32
  }
  func.func @transform_3(%arg0: i32) -> (i32, i32) {
    %c0_i32 = arith.constant 0 : i32
    %c0_i32_0 = arith.constant 0 : i32
    return %arg0, %c0_i32 : i32, i32
  }
}

</mosaic_0001>

<bundles_post_ra>
// kernel: wav2vec2_regression_head.1
= control target key start
LH: loop header
LB: loop body
LE: loop exit
PB: predicated region body
PF: predicated region fallthrough
CT: control target
= control target key end

     0   :  { %8 = vsyncpa [#allocation3], 0  ;;  %s721_s0 = inlined_call_operand.hbm [shape: f32[16,32], index: 0, kind: input, shape index: {}]   ;;  %s722_s1 = inlined_call_operand.hbm [shape: f32[32,128], index: 1, kind: input, shape index: {}]   ;;  %s723_s2 = inlined_call_operand.vmem [shape: f32[1,128], index: 2, kind: input, shape index: {}]   ;;  %s724_s3 = inlined_call_operand.vmem [shape: f32[16,128], index: 3, kind: output, shape index: {}]  }
   0x1   :  { %10 = vsyncpa [#allocation3 + $0x1], 0 }
   0x2   :  { %11 = vsyncpa [#allocation5], 0  ;;  %s579_s12 = smov 0   ;;  %s581_s13 = smov 0  }
   0x3   :  { %s583_s14 = smov 0   ;;  %s585_s15 = smov 0  }
   0x4 LB: > { %s598_s16 = sadd.s32 4294967295, %s550_s15   ;;  %p37_p0 = scmp.ne.s32.totalorder %s542_s13, %s538_s12  ;;  %s550_s15 = sphi %s585_s15, %s739_s15   ;;  %s546_s14 = sphi %s583_s14, %s738_s14   ;;  %s542_s13 = sphi %s581_s13, %s737_s13   ;;  %s538_s12 = sphi %s579_s12, %s736_s12  }
   0x5   : > { %p725_p1 = scmp.eq.s32.totalorder %s598_s16, 0  ;;  %p364_p2 = scmp.ge.s32.totalorder %s550_s15, 1 }
   0x6   : > { %p116_p3 = scmp.lt.s32.totalorder %s550_s15, 3  ;;  %s552_s19 = smov [#allocation4]  }
   0x7   : > { %p606_p4 = por %p725_p1, %p37_p0  ;;  %s128_s20 = sshll.u32 %s552_s19, 4  ;;  %s129_s20 = int_to_ptr.vmem [resolvable:$true] %s128_s20 }
   0x8   : > { %p610_p5 = pnand %p364_p2, %p116_p3  ;;  %s623_s22 = sadd.s32 1, %s550_s15  }
   0x9   : > { %s728_s17 = scalar_select %p606_p4, 1, 0 }
   0xa   : > { %s729_s18 = scalar_select %p610_p5, 1, 0 }
   0xb   : > { %p405_p6 = pneg %p610_p5  ;;  %s24_s23 = sadd.s32 1, %s546_s14 }
   0xc   : > { %s21_s24 = ssub.s32 %s550_s15, %s623_s22  ;;  %s454_s27 = scalar_lea.hbm %s722_s1, 512 }
   0xd   : > { %p618_p7 = pnand %p405_p6, %p725_p1  ;;  %p455_p8 = scmp.ne.s32.totalorder %s722_s1, %s454_s27 }
   0xe   : > { %p461_p12 = scmp.lt.u32.totalorder %s454_s27, %s722_s1 }
   0xf   : > { %p456_p9 = pneg %p618_p7 }
  0x11   : > { %p457_p10 = pnand %p456_p9, %p455_p8 }
  0x13   : > { %p458_p11 = pneg %p457_p10 }
  0x15   : > { %p463_p13 = pnand %p461_p12, %p458_p11 }
  0x17   : > { %466 = shalt.err (!%p463_p13)
}
  0x18   : > { %s467_s5 = scalar_lea.vmem %s129_s20, 512  ;;  %p475_p6 = scmp.lt.s32.totalorder %s129_s20, %s129_s20 }
  0x19   : > { %p468_p0 = scmp.ne.s32.totalorder %s129_s20, %s467_s5  ;;  %p476_p1 = scmp.lt.s32.totalorder %s467_s5, %s467_s5 }
  0x1b   : > { %p470_p2 = pnand %p468_p0, %p456_p9  ;;  %p477_p4 = por %p476_p1, %p475_p6 }
  0x1d   : > { %p471_p3 = pneg %p470_p2 }
  0x1f   : > { %p478_p5 = pnand %p477_p4, %p471_p3 }
  0x21   : > { %481 = shalt.err (!%p478_p5)
}
  0x22   : > { %s553_s6 = smov 128   ;;  %s554_s7 = smov 8  }
  0x23   : > { %408 = dma.hbm_to_vmem [thread:$0]  (!%p618_p7), %s722_s1, 512, %s129_s20, [#allocation5], %s553_s6, %s553_s6, %s554_s7  }
  0x24   : > { %p22_p8 = scmp.eq.s32.totalorder %s21_s24, 0  ;;  %p31_p9 = scmp.ne.s32.totalorder %s546_s14, %s542_s13 }
  0x25   : > { %p32_p1 = scmp.eq.s32.totalorder %s550_s15, 0  ;;  %p414_p4 = scmp.lt.s32.totalorder %s550_s15, 2 }
  0x26   : > { %s649_s10 = scalar_select %p22_p8, %s546_s14, %s24_s23  }
  0x27   : > { %p33_p5 = por %p32_p1, %p31_p9  ;;  %s145_s11 = sand.u32 1, %s546_s14  }
  0x28   : > { %s367_s12 = sshll.u32 %s145_s11, 3  ;;  %s368_s19 = sshll.u32 %s550_s15, 7 }
  0x29   : > { %s656_s27 = scalar_lea.hbm %s721_s0, %s368_s19  ;;  %s149_s20 = scalar_lea.vmem [#allocation2], %s367_s12 }
  0x2a   : > { %s156_s21 = sshll.u32 %s149_s20, 4  ;;  %p660_p7 = pnand %p414_p4, %p33_p5  ;;  %s658_s21 = int_to_ptr.vmem [resolvable:$true] %s156_s21 }
  0x2b   : > { %s146_s15 = scalar_lea.sflag [#allocation3], %s145_s11  ;;  %s482_s24 = scalar_lea.hbm %s656_s27, 128 }
  0x2c   : > { %p483_p10 = scmp.ne.s32.totalorder %s656_s27, %s482_s24  ;;  %p484_p11 = pneg %p660_p7 }
  0x2d   : > { %s487_s30 = scalar_lea.hbm %s721_s0, 256  ;;  %p488_p0 = scmp.lt.u32.totalorder %s656_s27, %s721_s0 }
  0x2e   : > { %p485_p12 = pnand %p484_p11, %p483_p10  ;;  %p489_p2 = scmp.lt.u32.totalorder %s487_s30, %s482_s24 }
  0x2f   : > { %p491_p6 = scmp.lt.u32.totalorder %s482_s24, %s656_s27 }
  0x30   : > { %p486_p13 = pneg %p485_p12  ;;  %p490_p3 = por %p489_p2, %p488_p0 }
  0x32   : > { %p492_p8 = por %p491_p6, %p490_p3 }
  0x34   : > { %p493_p9 = pnand %p492_p8, %p486_p13 }
  0x36   : > { %496 = shalt.err (!%p493_p9)
}
  0x37   : > { %s497_s6 = scalar_lea.vmem %s658_s21, 128  ;;  %s555_s7 = smov [#allocation2]  }
  0x38   : > { %p498_p1 = scmp.ne.s32.totalorder %s658_s21, %s497_s6  ;;  %s502_s8 = sshll.u32 %s555_s7, 4  ;;  %s503_s8 = int_to_ptr.vmem [resolvable:$false] %s502_s8 }
  0x39   : > { %s504_s9 = scalar_lea.vmem %s503_s8, 256  ;;  %p505_p10 = scmp.lt.s32.totalorder %s658_s21, %s503_s8 }
  0x3a   : > { %p500_p4 = pnand %p498_p1, %p484_p11  ;;  %p506_p12 = scmp.lt.s32.totalorder %s504_s9, %s497_s6 }
  0x3c   : > { %p501_p5 = pneg %p500_p4  ;;  %p507_p0 = por %p506_p12, %p505_p10 }
  0x3e   : > { %p508_p2 = pnand %p507_p0, %p501_p5 }
  0x40   : > { %511 = shalt.err (!%p508_p2)
}
  0x41   : > { %412 = dma.hbm_to_vmem [thread:$0]  (!%p660_p7), %s656_s27, 128, %s658_s21, %s146_s15  }
  0x42   : > { %p732_p13 = scmp.ne.s32.totalorder %s729_s18, 0 }
  0x43   : > { %s167_s11 = sand.u32 (!%p732_p13), 1, %s542_s13   ;;  %p733_p11 = scmp.ne.s32.totalorder (!%p732_p13), %s728_s17, 0 }
  0x44   : > { %165 = sbr.rel (%p732_p13) target bundleno = 304 (0x130), region = 32  ;;  %s370_s12 = sshll.u32 (!%p732_p13), %s167_s11, 3 }
  0x45   : > { %s168_s19 = scalar_lea.sflag (!%p732_p13), [#allocation3], %s167_s11  ;;  %s171_s25 = scalar_lea.vmem (!%p732_p13), [#allocation2], %s370_s12 }
  0x4b   : > { %529 = dma.done.wait (%p733_p11), %s168_s19, 128  }
  0x4c   : > { %531 = vsyncadd (%p733_p11), %s168_s19, 4294967168  ;;  %p734_p3 = scmp.eq.s32.totalorder %s598_s16, 0 }
  0x4e   : > { %533 = dma.done.wait (%p734_p3), [#allocation5], 512   ;;  %p735_p6 = pmov %p734_p3 }
  0x4f   : > { %v556_v0 = vmov 0.0|0.0   ;;  %vm557_vm0 = vmmov 0   ;;  %v558_v1 = vmov 0.0   ;;  %v202_v2 = vld [vmem:[#allocation4] sm:$0xff]  ;;  %v203_v3 = vld [vmem:[#allocation4 + $0x8] sm:$0xff]  ;;  %v204_v4 = vld [vmem:[#allocation4 + $0x10] sm:$0xff] }
  0x50   : > { %535 = vsyncadd (%p735_p6), [#allocation5], 4294966784  ;;  %393 = vmatprep.subr.bf16.mxu0 %v556_v0  ;;  %390 = vmatprep.mubr.msk.f32.mxu0 %vm557_vm0, %v558_v1  ;;  %v394_v5 = vpack.c.bf16 %v203_v3, %v202_v2  ;;  %v205_v6 = vld [vmem:[#allocation4 + $0x18] sm:$0xff]  ;;  %vm213_vm1 = vcmask 261120   ;;  %p197_p7 = scmp.lt.s32.totalorder %s598_s16, 1 }
  0x51   : > { %v397_v7 = vpack.c.bf16 %v205_v6, %v204_v4  ;;  %v201_v8 = vld [vmem:[%s171_s25] sm:$0xff] }
  0x52   : > { %395 = vmatpush3.bf16.msra.mxu0 %v394_v5  ;;  %s741_s16 = smov (!%p197_p7, %s598_s16), 1  ;;  %v373_v9 = vld [vmem:[%s723_s2] ss:$0 sm:$0xff] }
  0x53   : > { %396 = vmatprep.subr.bf16.mxu0 %v556_v0  ;;  %s372_s17 = sshll.u32 %s741_s16, 3 }
  0x54   : > { %s200_s21 = scalar_lea.vmem %s724_s3, %s372_s17 }
  0x56   : > { %398 = vmatpush3.bf16.msra.mxu0 %v397_v7 }
  0x59   : > { %391 = vmatmul.mubr.msk.f32.vlgmr.msra.gmra.mrb[0].mxu0 %vm213_vm1, %v201_v8 }
 0x12c   : > { %v283_v10 = vpop.f32.mrb[0].mxu0 }
 0x12d   : > { %v284_v11 = vadd.f32 %v373_v9, %v283_v10  ;;  %v392_v12 = vpop.f32.mrb[1].mxu0 }
 0x12f   : > { %287 = vst [vmem:[%s200_s21] sm:$0xff] %v284_v11 }
 0x130 PF: > { %p14_p8 = scmp.ge.s32.totalorder %s623_s22, 4   ;;  %s736_s12 = smov %s542_s13 }
 0x131   : > { %s737_s13 = smov %s546_s14  ;;  %s738_s14 = smov %s649_s10 }
 0x132   : > { %s739_s15 = smov %s623_s22  ;;  %16 = sbr.rel (!%p14_p8) target bundleno = 4 (0x4), region = 76 }
 0x139   :  { %307 = vsyncpa [#allocation3], 1 }
 0x13a   :  { %309 = vsyncpa [#allocation3 + $0x1], 1 }
 0x13b   :  { %310 = vsyncpa [#allocation5], 1 }

</bundles_post_ra>
